<compile_context>
chip_gen: v7x
topology: tpu7x:2x2x1
jax: 0.10.0
libtpu: 0.0.40
codegen_flags: <defaults>
</compile_context>

<pallas_src>
import jax
import jax.numpy as jnp
from jax.experimental import pallas as pl
from jax.experimental.pallas import tpu as pltpu

EPS = 1e-5

# TODO(synk): flip to jnp.bfloat16 to halve y1/y2 HBM traffic (review item);
# kept f32 so the demo's 2e-4 tolerance against the f32 reference holds.
INTERMEDIATE_DTYPE = jnp.float32


# ---------------------------------------------------------------------------
# in-kernel helpers
# ---------------------------------------------------------------------------
def _conv_k3(x, w3):
    """x: (TB, L, C); w3: (3, C, Cout). Conv1d(k=3, padding=1), no bias.

    Three per-tap MXU matmuls accumulated in f32 on L-shifted views
    (no 3x-wide im2col temporary)."""
    TB, L, C = x.shape
    Cout = w3.shape[-1]
    z = jnp.zeros((TB, 1, C), x.dtype)
    x_m1 = jnp.concatenate([z, x[:, :-1, :]], axis=1)        # x[l-1]
    x_p1 = jnp.concatenate([x[:, 1:, :], z], axis=1)         # x[l+1]

    def mm(a, w):
        return jnp.dot(a.reshape(TB * L, C).astype(jnp.float32), w,
                       preferred_element_type=jnp.float32)

    y = mm(x_m1, w3[0]) + mm(x, w3[1]) + mm(x_p1, w3[2])     # (TB*L, Cout)
    return y.reshape(TB, L, Cout)


def _stats_row(y):
    """y: (TB, L, C) -> (1, 2C): lane-dense [sum | sum of squares] over rows."""
    yf = y.reshape(-1, y.shape[-1])
    return jnp.concatenate([jnp.sum(yf, axis=0, keepdims=True),
                            jnp.sum(yf * yf, axis=0, keepdims=True)], axis=-1)


# ---------------------------------------------------------------------------
# kernels (one (TB, L, C) batch block per grid step)
# ---------------------------------------------------------------------------
def conv1_stats_kernel(x2_ref, x1_ref, wa_ref, wb_ref, y_ref, st_ref):
    """conv1 over concat([x2, x1u], channels) expressed as two weight
    row-blocks accumulated in one f32 accumulator; bias omitted (cancels
    under training-mode BN). Emits per-block (sum, sumsq) for global BN1."""
    y = _conv_k3(x2_ref[...], wa_ref[...]) + _conv_k3(x1_ref[...], wb_ref[...])
    y_ref[...] = y.astype(y_ref.dtype)
    st_ref[0] = _stats_row(y)


def bn_relu_conv2_stats_kernel(y1_ref, s_ref, b_ref, w_ref, y_ref, st_ref):
    """fused BN1 (folded to scale,shift) + ReLU preamble, then conv2 + stats."""
    a = jnp.maximum(
        y1_ref[...].astype(jnp.float32) * s_ref[...] + b_ref[...], 0.0)
    y = _conv_k3(a, w_ref[...])
    y_ref[...] = y.astype(y_ref.dtype)
    st_ref[0] = _stats_row(y)


# ---------------------------------------------------------------------------
# wrapper-side helpers (plain JAX; all fuse under the single jit)
# ---------------------------------------------------------------------------
def _upsample_linear_ac(x, scale=2):
    """nn.Upsample(scale_factor=2, mode='linear', align_corners=True), NCL."""
    B, C, L = x.shape
    Lout = L * scale
    if L == 1:
        return jnp.broadcast_to(x, (B, C, Lout))
    src = jnp.arange(Lout, dtype=jnp.float32) * (L - 1) / (Lout - 1)
    lo = jnp.clip(jnp.floor(src).astype(jnp.int32), 0, L - 2)
    w = src - lo.astype(jnp.float32)
    return x[:, :, lo] * (1.0 - w) + x[:, :, lo + 1] * w


def _pad_or_crop_len(x, left, right):
    """F.pad semantics along the last axis (negative widths crop)."""
    if left < 0 or right < 0:
        start = max(0, -left)
        stop = x.shape[2] - max(0, -right)
        x = x[:, :, start:stop]
        left, right = max(0, left), max(0, right)
    if left or right:
        x = jnp.pad(x, ((0, 0), (0, 0), (left, right)))
    return x


def _mean_var_packed(st, n, cout):
    s = jnp.sum(st, axis=(0, 1))                  # (2*Cout,)
    mean = s[:cout] / n
    # TODO(synk): E[y^2]-E[y]^2 in f32 can cancel for very large B*L or huge
    # activations; switch to per-block centered sums + Chan's combine if needed.
    var = jnp.maximum(s[cout:] / n - mean * mean, 0.0)
    return mean.reshape(1, -1), var.reshape(1, -1)


def _scale_shift(mean, var, gamma, beta):
    scale = gamma.reshape(1, -1) * jax.lax.rsqrt(var + EPS)
    shift = beta.reshape(1, -1) - mean * scale
    return scale, shift


def _pick_tb(B, L):
    """Largest TB with B % TB == 0, TB*L <= ~512 rows, and >=2 grid steps when
    B >= 2 (so v7x's two TensorCores both get work)."""
    max_rows = 512
    best = 1
    for tb in range(1, B + 1):
        if B % tb != 0 or tb * L > max_rows:
            continue
        if B >= 2 and (B // tb) < 2:
            continue
        best = tb
    return best


def _up_forward_impl(x1, x2, params):
    """x1: (B, C1, L1), x2: (B, C2, L2), both NCL -> (B, Cout, L2) NCL."""
    B, C1, L1 = x1.shape
    _, C2, L2 = x2.shape
    Cout = params["w1"].shape[0]
    Cin = C1 + C2
    L = L2
    f32 = jnp.float32

    # --- layout plumbing (kept out of the kernels; fuses under jit) ---------
    # TODO(synk): the linear-upsample gather stays as XLA preprocessing; fusing
    # it into the kernel would force cross-sublane gathers.
    x1u = _upsample_linear_ac(x1.astype(f32), 2)              # (B, C1, 2*L1)
    diff = L - x1u.shape[2]
    x1u = _pad_or_crop_len(x1u, diff // 2, diff - diff // 2)  # F.pad semantics
    x2_nlc = jnp.transpose(x2.astype(f32), (0, 2, 1))         # (B, L, C2)
    x1_nlc = jnp.transpose(x1u, (0, 2, 1))                    # (B, L, C1)

    # per-input tap-major weights (channel order of concat([x2, x1u], dim=1))
    w1a = jnp.transpose(params["w1"][:, :C2, :], (2, 1, 0))   # (3, C2, Cout)
    w1b = jnp.transpose(params["w1"][:, C2:, :], (2, 1, 0))   # (3, C1, Cout)
    w2_3 = jnp.transpose(params["w2"], (2, 1, 0))             # (3, Cout, Cout)

    TB = _pick_tb(B, L)
    nb = B // TB

    cparams = pltpu.CompilerParams(
        dimension_semantics=("parallel",),        # batch blocks -> 2 TCs on v7x
        # TODO(synk): re-derive the block/VMEM budget (add an L grid axis with
        # a 1-row halo) if L*C grows; v7x has only 64 MiB VMEM.
        vmem_limit_bytes=32 * 1024 * 1024)

    def act_spec(c):
        return pl.BlockSpec((TB, L, c), lambda b: (b, 0, 0))

    def rep_spec(shape):
        return pl.BlockSpec(shape, lambda b: (0,) * len(shape))

    st_spec = pl.BlockSpec((1, 1, 2 * Cout), lambda b: (b, 0, 0))
    act_out = jax.ShapeDtypeStruct((B, L, Cout), INTERMEDIATE_DTYPE)
    st_out = jax.ShapeDtypeStruct((nb, 1, 2 * Cout), f32)

    # ---- stage 1: conv1 (two weight row-blocks, no concat) + BN1 stats ----
    y1, st1 = pl.pallas_call(
        conv1_stats_kernel,
        out_shape=(act_out, st_out),
        grid=(nb,),
        in_specs=[act_spec(C2), act_spec(C1),
                  rep_spec((3, C2, Cout)), rep_spec((3, C1, Cout))],
        out_specs=(act_spec(Cout), st_spec),
        compiler_params=cparams,
        cost_estimate=pl.CostEstimate(
            flops=2 * B * L * 3 * Cin * Cout, transcendentals=0,
            bytes_accessed=4 * (B * L * Cin + 3 * Cin * Cout
                                + B * L * Cout + nb * 2 * Cout)),
    )(x2_nlc, x1_nlc, w1a, w1b)
    mean1, var1 = _mean_var_packed(st1, B * L, Cout)
    scale1, shift1 = _scale_shift(mean1, var1, params["g1"], params["be1"])

    # ---- stage 2: BN1 + ReLU + conv2 + BN2 stats ----
    y2, st2 = pl.pallas_call(
        bn_relu_conv2_stats_kernel,
        out_shape=(act_out, st_out),
        grid=(nb,),
        in_specs=[act_spec(Cout), rep_spec((1, Cout)), rep_spec((1, Cout)),
                  rep_spec((3, Cout, Cout))],
        out_specs=(act_spec(Cout), st_spec),
        compiler_params=cparams,
        cost_estimate=pl.CostEstimate(
            flops=2 * B * L * 3 * Cout * Cout + 3 * B * L * Cout,
            transcendentals=0,
            bytes_accessed=4 * (2 * B * L * Cout + 2 * Cout
                                + 3 * Cout * Cout + nb * 2 * Cout)),
    )(y1, scale1, shift1, w2_3)
    mean2, var2 = _mean_var_packed(st2, B * L, Cout)
    scale2, shift2 = _scale_shift(mean2, var2, params["g2"], params["be2"])

    # ---- epilogue: BN2 + ReLU + NLC->NCL, fused by XLA inside the jit ----
    # (review-sanctioned: one read of y2 + one write of the NCL output; no
    #  extra HBM round trip for a standalone transpose.)
    out_nlc = jnp.maximum(
        y2.astype(f32) * scale2.reshape(1, 1, -1) + shift2.reshape(1, 1, -1),
        0.0)
    return jnp.transpose(out_nlc, (0, 2, 1))


up_forward = jax.jit(_up_forward_impl)


# ---------------------------------------------------------------------------
# pure-JAX reference (mirrors the PyTorch `up` forward, training-mode BN)
# ---------------------------------------------------------------------------
def up_ref(x1, x2, p):
    x1u = _upsample_linear_ac(x1, 2)
    diff = x2.shape[2] - x1u.shape[2]
    x1u = _pad_or_crop_len(x1u, diff // 2, diff - diff // 2)
    x = jnp.concatenate([x2, x1u], axis=1)                    # NCL

    def block(xin, w, b, g, be):
        y = jax.lax.conv_general_dilated(
            xin, w, window_strides=(1,), padding=((1, 1),),
            dimension_numbers=("NCH", "OIH", "NCH"))
        y = y + b.reshape(1, -1, 1)
        m = jnp.mean(y, axis=(0, 2), keepdims=True)
        v = jnp.mean((y - m) ** 2, axis=(0, 2), keepdims=True)
        y = (y - m) / jnp.sqrt(v + EPS)
        y = y * g.reshape(1, -1, 1) + be.reshape(1, -1, 1)
        return jnp.maximum(y, 0.0)

    y = block(x, p["w1"], p["b1"], p["g1"], p["be1"])
    y = block(y, p["w2"], p["b2"], p["g2"], p["be2"])
    return y


def make_params(key, in_ch, out_ch):
    ks = jax.random.split(key, 8)
    f32 = jnp.float32
    return {
        "w1": 0.2 * jax.random.normal(ks[0], (out_ch, in_ch, 3), f32),
        "b1": 0.1 * jax.random.normal(ks[1], (out_ch,), f32),
        "g1": 1.0 + 0.1 * jax.random.normal(ks[2], (out_ch,), f32),
        "be1": 0.1 * jax.random.normal(ks[3], (out_ch,), f32),
        "w2": 0.2 * jax.random.normal(ks[4], (out_ch, out_ch, 3), f32),
        "b2": 0.1 * jax.random.normal(ks[5], (out_ch,), f32),
        "g2": 1.0 + 0.1 * jax.random.normal(ks[6], (out_ch,), f32),
        "be2": 0.1 * jax.random.normal(ks[7], (out_ch,), f32),
    }


if __name__ == "__main__":
    B = 2
    in_channels, out_channels = 8, 8        # up(in_channels=8, out_channels=8)
    C1 = C2 = in_channels // 2
    L1, L2 = 8, 16
    key = jax.random.PRNGKey(0)
    k1, k2, kp = jax.random.split(key, 3)
    x1 = jax.random.normal(k1, (B, C1, L1), jnp.float32)   # deep feature (upsampled)
    x2 = jax.random.normal(k2, (B, C2, L2), jnp.float32)   # skip connection
    params = make_params(kp, in_channels, out_channels)

    out = up_forward(x1, x2, params)
    out = jax.block_until_ready(out)

    ref = up_ref(x1, x2, params)
    assert out.shape == (B, out_channels, L2), out.shape
    err = jnp.max(jnp.abs(out - ref))
    assert jnp.allclose(out, ref, atol=2e-4, rtol=2e-3), f"mismatch vs ref: {err}"

    print("KERNEL_OK")
</pallas_src>

<mosaic_0001>
module attributes {stable_mosaic.version = 11 : i64} {
  func.func @conv1_stats_kernel(%arg0: i32, %arg1: memref<1x16x4xf32, #tpu.memory_space<vmem>>, %arg2: memref<1x16x4xf32, #tpu.memory_space<vmem>>, %arg3: memref<3x4x8xf32, #tpu.memory_space<vmem>>, %arg4: memref<3x4x8xf32, #tpu.memory_space<vmem>>, %arg5: memref<1x16x8xf32, #tpu.memory_space<vmem>>, %arg6: memref<1x1x16xf32, #tpu.memory_space<vmem>>) attributes {dimension_semantics = [#tpu.dimension_semantics<parallel>], iteration_bounds = array<i64: 2>, scalar_prefetch = 0 : i64, scratch_operands = 0 : i64, tpu.core_type = #tpu.core_type<tc>, window_params = [{transform_indices = @transform_0, window_bounds = array<i64: 1, 16, 4>}, {transform_indices = @transform_1, window_bounds = array<i64: 1, 16, 4>}, {pipeline_mode = #tpu.pipeline_mode<synchronous>, transform_indices = @transform_2, window_bounds = array<i64: 3, 4, 8>}, {pipeline_mode = #tpu.pipeline_mode<synchronous>, transform_indices = @transform_3, window_bounds = array<i64: 3, 4, 8>}, {transform_indices = @transform_4, window_bounds = array<i64: 1, 16, 8>}, {transform_indices = @transform_5, window_bounds = array<i64: 1, 1, 16>}]} {
    %c0 = arith.constant 0 : index
    %c0_0 = arith.constant 0 : index
    %c0_1 = arith.constant 0 : index
    %0 = vector.load %arg1[%c0, %c0_0, %c0_1] : memref<1x16x4xf32, #tpu.memory_space<vmem>>, vector<1x16x4xf32>
    %c0_2 = arith.constant 0 : index
    %c0_3 = arith.constant 0 : index
    %c0_4 = arith.constant 0 : index
    %1 = vector.load %arg3[%c0_2, %c0_3, %c0_4] : memref<3x4x8xf32, #tpu.memory_space<vmem>>, vector<3x4x8xf32>
    %cst = arith.constant 0.000000e+00 : f32
    %2 = vector.broadcast %cst : f32 to vector<1x1x4xf32>
    %3 = vector.extract_strided_slice %0 {offsets = [0, 0, 0], sizes = [1, 15, 4], strides = [1, 1, 1]} : vector<1x16x4xf32> to vector<1x15x4xf32>
    %4 = tpu.concatenate %2, %3 in 1 : vector<1x1x4xf32>, vector<1x15x4xf32> -> vector<1x16x4xf32>
    %5 = vector.extract_strided_slice %0 {offsets = [0, 1, 0], sizes = [1, 15, 4], strides = [1, 1, 1]} : vector<1x16x4xf32> to vector<1x15x4xf32>
    %6 = tpu.concatenate %5, %2 in 1 : vector<1x15x4xf32>, vector<1x1x4xf32> -> vector<1x16x4xf32>
    %7 = vector.extract_strided_slice %1 {offsets = [0, 0, 0], sizes = [1, 4, 8], strides = [1, 1, 1]} : vector<3x4x8xf32> to vector<1x4x8xf32>
    %8 = vector.shape_cast %7 : vector<1x4x8xf32> to vector<4x8xf32>
    %9 = vector.shape_cast %4 : vector<1x16x4xf32> to vector<16x4xf32>
    %cst_5 = arith.constant dense<0.000000e+00> : vector<16x8xf32>
    %10 = tpu.matmul %9, %8, %cst_5 {dimension_numbers = #tpu.dot_dimension_numbers<[1], [0], [0], [1], [0, 0, 1, 1], [], []>} : vector<16x4xf32>, vector<4x8xf32>, vector<16x8xf32> -> vector<16x8xf32>
    %11 = vector.extract_strided_slice %1 {offsets = [1, 0, 0], sizes = [1, 4, 8], strides = [1, 1, 1]} : vector<3x4x8xf32> to vector<1x4x8xf32>
    %12 = vector.shape_cast %11 : vector<1x4x8xf32> to vector<4x8xf32>
    %13 = vector.shape_cast %0 : vector<1x16x4xf32> to vector<16x4xf32>
    %cst_6 = arith.constant dense<0.000000e+00> : vector<16x8xf32>
    %14 = tpu.matmul %13, %12, %cst_6 {dimension_numbers = #tpu.dot_dimension_numbers<[1], [0], [0], [1], [0, 0, 1, 1], [], []>} : vector<16x4xf32>, vector<4x8xf32>, vector<16x8xf32> -> vector<16x8xf32>
    %15 = arith.addf %10, %14 : vector<16x8xf32>
    %16 = vector.extract_strided_slice %1 {offsets = [2, 0, 0], sizes = [1, 4, 8], strides = [1, 1, 1]} : vector<3x4x8xf32> to vector<1x4x8xf32>
    %17 = vector.shape_cast %16 : vector<1x4x8xf32> to vector<4x8xf32>
    %18 = vector.shape_cast %6 : vector<1x16x4xf32> to vector<16x4xf32>
    %cst_7 = arith.constant dense<0.000000e+00> : vector<16x8xf32>
    %19 = tpu.matmul %18, %17, %cst_7 {dimension_numbers = #tpu.dot_dimension_numbers<[1], [0], [0], [1], [0, 0, 1, 1], [], []>} : vector<16x4xf32>, vector<4x8xf32>, vector<16x8xf32> -> vector<16x8xf32>
    %20 = arith.addf %15, %19 : vector<16x8xf32>
    %21 = vector.shape_cast %20 : vector<16x8xf32> to vector<1x16x8xf32>
    %c0_8 = arith.constant 0 : index
    %c0_9 = arith.constant 0 : index
    %c0_10 = arith.constant 0 : index
    %22 = vector.load %arg2[%c0_8, %c0_9, %c0_10] : memref<1x16x4xf32, #tpu.memory_space<vmem>>, vector<1x16x4xf32>
    %c0_11 = arith.constant 0 : index
    %c0_12 = arith.constant 0 : index
    %c0_13 = arith.constant 0 : index
    %23 = vector.load %arg4[%c0_11, %c0_12, %c0_13] : memref<3x4x8xf32, #tpu.memory_space<vmem>>, vector<3x4x8xf32>
    %cst_14 = arith.constant 0.000000e+00 : f32
    %24 = vector.broadcast %cst_14 : f32 to vector<1x1x4xf32>
    %25 = vector.extract_strided_slice %22 {offsets = [0, 0, 0], sizes = [1, 15, 4], strides = [1, 1, 1]} : vector<1x16x4xf32> to vector<1x15x4xf32>
    %26 = tpu.concatenate %24, %25 in 1 : vector<1x1x4xf32>, vector<1x15x4xf32> -> vector<1x16x4xf32>
    %27 = vector.extract_strided_slice %22 {offsets = [0, 1, 0], sizes = [1, 15, 4], strides = [1, 1, 1]} : vector<1x16x4xf32> to vector<1x15x4xf32>
    %28 = tpu.concatenate %27, %24 in 1 : vector<1x15x4xf32>, vector<1x1x4xf32> -> vector<1x16x4xf32>
    %29 = vector.extract_strided_slice %23 {offsets = [0, 0, 0], sizes = [1, 4, 8], strides = [1, 1, 1]} : vector<3x4x8xf32> to vector<1x4x8xf32>
    %30 = vector.shape_cast %29 : vector<1x4x8xf32> to vector<4x8xf32>
    %31 = vector.shape_cast %26 : vector<1x16x4xf32> to vector<16x4xf32>
    %cst_15 = arith.constant dense<0.000000e+00> : vector<16x8xf32>
    %32 = tpu.matmul %31, %30, %cst_15 {dimension_numbers = #tpu.dot_dimension_numbers<[1], [0], [0], [1], [0, 0, 1, 1], [], []>} : vector<16x4xf32>, vector<4x8xf32>, vector<16x8xf32> -> vector<16x8xf32>
    %33 = vector.extract_strided_slice %23 {offsets = [1, 0, 0], sizes = [1, 4, 8], strides = [1, 1, 1]} : vector<3x4x8xf32> to vector<1x4x8xf32>
    %34 = vector.shape_cast %33 : vector<1x4x8xf32> to vector<4x8xf32>
    %35 = vector.shape_cast %22 : vector<1x16x4xf32> to vector<16x4xf32>
    %cst_16 = arith.constant dense<0.000000e+00> : vector<16x8xf32>
    %36 = tpu.matmul %35, %34, %cst_16 {dimension_numbers = #tpu.dot_dimension_numbers<[1], [0], [0], [1], [0, 0, 1, 1], [], []>} : vector<16x4xf32>, vector<4x8xf32>, vector<16x8xf32> -> vector<16x8xf32>
    %37 = arith.addf %32, %36 : vector<16x8xf32>
    %38 = vector.extract_strided_slice %23 {offsets = [2, 0, 0], sizes = [1, 4, 8], strides = [1, 1, 1]} : vector<3x4x8xf32> to vector<1x4x8xf32>
    %39 = vector.shape_cast %38 : vector<1x4x8xf32> to vector<4x8xf32>
    %40 = vector.shape_cast %28 : vector<1x16x4xf32> to vector<16x4xf32>
    %cst_17 = arith.constant dense<0.000000e+00> : vector<16x8xf32>
    %41 = tpu.matmul %40, %39, %cst_17 {dimension_numbers = #tpu.dot_dimension_numbers<[1], [0], [0], [1], [0, 0, 1, 1], [], []>} : vector<16x4xf32>, vector<4x8xf32>, vector<16x8xf32> -> vector<16x8xf32>
    %42 = arith.addf %37, %41 : vector<16x8xf32>
    %43 = vector.shape_cast %42 : vector<16x8xf32> to vector<1x16x8xf32>
    %44 = arith.addf %21, %43 : vector<1x16x8xf32>
    %c0_18 = arith.constant 0 : index
    %c0_19 = arith.constant 0 : index
    %c0_20 = arith.constant 0 : index
    %45 = vector.load %arg5[%c0_18, %c0_19, %c0_20] : memref<1x16x8xf32, #tpu.memory_space<vmem>>, vector<1x16x8xf32>
    tpu.vector_store %arg5[%c0_18, %c0_19, %c0_20], %44 {strides = array<i32>} : memref<1x16x8xf32, #tpu.memory_space<vmem>>, vector<1x16x8xf32>,
    %46 = vector.shape_cast %44 : vector<1x16x8xf32> to vector<16x8xf32>
    %cst_21 = arith.constant dense<0.000000e+00> : vector<8xf32>
    %47 = vector.multi_reduction <add>, %46, %cst_21 [0] : vector<16x8xf32> to vector<8xf32>
    %48 = vector.shape_cast %47 : vector<8xf32> to vector<1x8xf32>
    %49 = arith.mulf %46, %46 : vector<16x8xf32>
    %cst_22 = arith.constant dense<0.000000e+00> : vector<8xf32>
    %50 = vector.multi_reduction <add>, %49, %cst_22 [0] : vector<16x8xf32> to vector<8xf32>
    %51 = vector.shape_cast %50 : vector<8xf32> to vector<1x8xf32>
    %52 = tpu.concatenate %48, %51 in 1 : vector<1x8xf32>, vector<1x8xf32> -> vector<1x16xf32>
    %c0_23 = arith.constant 0 : index
    %c0_24 = arith.constant 0 : index
    %c0_25 = arith.constant 0 : index
    %53 = vector.load %arg6[%c0_23, %c0_24, %c0_25] : memref<1x1x16xf32, #tpu.memory_space<vmem>>, vector<1x1x16xf32>
    %54 = vector.shape_cast %53 : vector<1x1x16xf32> to vector<1x16xf32>
    %55 = vector.shape_cast %52 : vector<1x16xf32> to vector<1x1x16xf32>
    tpu.vector_store %arg6[%c0_23, %c0_24, %c0_25], %55 {strides = array<i32>} : memref<1x1x16xf32, #tpu.memory_space<vmem>>, vector<1x1x16xf32>,
    return
  }
  func.func @transform_0(%arg0: i32) -> (i32, i32, i32) {
    %c0_i32 = arith.constant 0 : i32
    %c0_i32_0 = arith.constant 0 : i32
    %c0_i32_1 = arith.constant 0 : i32
    return %arg0, %c0_i32, %c0_i32_0 : i32, i32, i32
  }
  func.func @transform_1(%arg0: i32) -> (i32, i32, i32) {
    %c0_i32 = arith.constant 0 : i32
    %c0_i32_0 = arith.constant 0 : i32
    %c0_i32_1 = arith.constant 0 : i32
    return %arg0, %c0_i32, %c0_i32_0 : i32, i32, i32
  }
  func.func @transform_2(%arg0: i32) -> (i32, i32, i32) {
    %c0_i32 = arith.constant 0 : i32
    %c0_i32_0 = arith.constant 0 : i32
    %c0_i32_1 = arith.constant 0 : i32
    %c0_i32_2 = arith.constant 0 : i32
    return %c0_i32, %c0_i32_0, %c0_i32_1 : i32, i32, i32
  }
  func.func @transform_3(%arg0: i32) -> (i32, i32, i32) {
    %c0_i32 = arith.constant 0 : i32
    %c0_i32_0 = arith.constant 0 : i32
    %c0_i32_1 = arith.constant 0 : i32
    %c0_i32_2 = arith.constant 0 : i32
    return %c0_i32, %c0_i32_0, %c0_i32_1 : i32, i32, i32
  }
  func.func @transform_4(%arg0: i32) -> (i32, i32, i32) {
    %c0_i32 = arith.constant 0 : i32
    %c0_i32_0 = arith.constant 0 : i32
    %c0_i32_1 = arith.constant 0 : i32
    return %arg0, %c0_i32, %c0_i32_0 : i32, i32, i32
  }
  func.func @transform_5(%arg0: i32) -> (i32, i32, i32) {
    %c0_i32 = arith.constant 0 : i32
    %c0_i32_0 = arith.constant 0 : i32
    %c0_i32_1 = arith.constant 0 : i32
    return %arg0, %c0_i32, %c0_i32_0 : i32, i32, i32
  }
}

module attributes {stable_mosaic.version = 11 : i64} {
  func.func @bn_relu_conv2_stats_kernel(%arg0: i32, %arg1: memref<1x16x8xf32, #tpu.memory_space<vmem>>, %arg2: memref<1x8xf32, #tpu.memory_space<vmem>>, %arg3: memref<1x8xf32, #tpu.memory_space<vmem>>, %arg4: memref<3x8x8xf32, #tpu.memory_space<vmem>>, %arg5: memref<1x16x8xf32, #tpu.memory_space<vmem>>, %arg6: memref<1x1x16xf32, #tpu.memory_space<vmem>>) attributes {dimension_semantics = [#tpu.dimension_semantics<parallel>], iteration_bounds = array<i64: 2>, scalar_prefetch = 0 : i64, scratch_operands = 0 : i64, tpu.core_type = #tpu.core_type<tc>, window_params = [{transform_indices = @transform_0, window_bounds = array<i64: 1, 16, 8>}, {pipeline_mode = #tpu.pipeline_mode<synchronous>, transform_indices = @transform_1, window_bounds = array<i64: 1, 8>}, {pipeline_mode = #tpu.pipeline_mode<synchronous>, transform_indices = @transform_2, window_bounds = array<i64: 1, 8>}, {pipeline_mode = #tpu.pipeline_mode<synchronous>, transform_indices = @transform_3, window_bounds = array<i64: 3, 8, 8>}, {transform_indices = @transform_4, window_bounds = array<i64: 1, 16, 8>}, {transform_indices = @transform_5, window_bounds = array<i64: 1, 1, 16>}]} {
    %c0 = arith.constant 0 : index
    %c0_0 = arith.constant 0 : index
    %c0_1 = arith.constant 0 : index
    %0 = vector.load %arg1[%c0, %c0_0, %c0_1] : memref<1x16x8xf32, #tpu.memory_space<vmem>>, vector<1x16x8xf32>
    %c0_2 = arith.constant 0 : index
    %c0_3 = arith.constant 0 : index
    %1 = vector.load %arg2[%c0_2, %c0_3] : memref<1x8xf32, #tpu.memory_space<vmem>>, vector<1x8xf32>
    %2 = vector.shape_cast %1 : vector<1x8xf32> to vector<1x1x8xf32>
    %3 = vector.broadcast %2 : vector<1x1x8xf32> to vector<1x16x8xf32>
    %4 = arith.mulf %0, %3 : vector<1x16x8xf32>
    %c0_4 = arith.constant 0 : index
    %c0_5 = arith.constant 0 : index
    %5 = vector.load %arg3[%c0_4, %c0_5] : memref<1x8xf32, #tpu.memory_space<vmem>>, vector<1x8xf32>
    %6 = vector.shape_cast %5 : vector<1x8xf32> to vector<1x1x8xf32>
    %7 = vector.broadcast %6 : vector<1x1x8xf32> to vector<1x16x8xf32>
    %8 = arith.addf %4, %7 : vector<1x16x8xf32>
    %cst = arith.constant 0.000000e+00 : f32
    %9 = vector.broadcast %cst : f32 to vector<1x16x8xf32>
    %10 = arith.maximumf %8, %9 : vector<1x16x8xf32>
    %c0_6 = arith.constant 0 : index
    %c0_7 = arith.constant 0 : index
    %c0_8 = arith.constant 0 : index
    %11 = vector.load %arg4[%c0_6, %c0_7, %c0_8] : memref<3x8x8xf32, #tpu.memory_space<vmem>>, vector<3x8x8xf32>
    %cst_9 = arith.constant 0.000000e+00 : f32
    %12 = vector.broadcast %cst_9 : f32 to vector<1x1x8xf32>
    %13 = vector.extract_strided_slice %10 {offsets = [0, 0, 0], sizes = [1, 15, 8], strides = [1, 1, 1]} : vector<1x16x8xf32> to vector<1x15x8xf32>
    %14 = tpu.concatenate %12, %13 in 1 : vector<1x1x8xf32>, vector<1x15x8xf32> -> vector<1x16x8xf32>
    %15 = vector.extract_strided_slice %10 {offsets = [0, 1, 0], sizes = [1, 15, 8], strides = [1, 1, 1]} : vector<1x16x8xf32> to vector<1x15x8xf32>
    %16 = tpu.concatenate %15, %12 in 1 : vector<1x15x8xf32>, vector<1x1x8xf32> -> vector<1x16x8xf32>
    %17 = vector.extract_strided_slice %11 {offsets = [0, 0, 0], sizes = [1, 8, 8], strides = [1, 1, 1]} : vector<3x8x8xf32> to vector<1x8x8xf32>
    %18 = vector.shape_cast %17 : vector<1x8x8xf32> to vector<8x8xf32>
    %19 = vector.shape_cast %14 : vector<1x16x8xf32> to vector<16x8xf32>
    %cst_10 = arith.constant dense<0.000000e+00> : vector<16x8xf32>
    %20 = tpu.matmul %19, %18, %cst_10 {dimension_numbers = #tpu.dot_dimension_numbers<[1], [0], [0], [1], [0, 0, 1, 1], [], []>} : vector<16x8xf32>, vector<8x8xf32>, vector<16x8xf32> -> vector<16x8xf32>
    %21 = vector.extract_strided_slice %11 {offsets = [1, 0, 0], sizes = [1, 8, 8], strides = [1, 1, 1]} : vector<3x8x8xf32> to vector<1x8x8xf32>
    %22 = vector.shape_cast %21 : vector<1x8x8xf32> to vector<8x8xf32>
    %23 = vector.shape_cast %10 : vector<1x16x8xf32> to vector<16x8xf32>
    %cst_11 = arith.constant dense<0.000000e+00> : vector<16x8xf32>
    %24 = tpu.matmul %23, %22, %cst_11 {dimension_numbers = #tpu.dot_dimension_numbers<[1], [0], [0], [1], [0, 0, 1, 1], [], []>} : vector<16x8xf32>, vector<8x8xf32>, vector<16x8xf32> -> vector<16x8xf32>
    %25 = arith.addf %20, %24 : vector<16x8xf32>
    %26 = vector.extract_strided_slice %11 {offsets = [2, 0, 0], sizes = [1, 8, 8], strides = [1, 1, 1]} : vector<3x8x8xf32> to vector<1x8x8xf32>
    %27 = vector.shape_cast %26 : vector<1x8x8xf32> to vector<8x8xf32>
    %28 = vector.shape_cast %16 : vector<1x16x8xf32> to vector<16x8xf32>
    %cst_12 = arith.constant dense<0.000000e+00> : vector<16x8xf32>
    %29 = tpu.matmul %28, %27, %cst_12 {dimension_numbers = #tpu.dot_dimension_numbers<[1], [0], [0], [1], [0, 0, 1, 1], [], []>} : vector<16x8xf32>, vector<8x8xf32>, vector<16x8xf32> -> vector<16x8xf32>
    %30 = arith.addf %25, %29 : vector<16x8xf32>
    %31 = vector.shape_cast %30 : vector<16x8xf32> to vector<1x16x8xf32>
    %c0_13 = arith.constant 0 : index
    %c0_14 = arith.constant 0 : index
    %c0_15 = arith.constant 0 : index
    %32 = vector.load %arg5[%c0_13, %c0_14, %c0_15] : memref<1x16x8xf32, #tpu.memory_space<vmem>>, vector<1x16x8xf32>
    tpu.vector_store %arg5[%c0_13, %c0_14, %c0_15], %31 {strides = array<i32>} : memref<1x16x8xf32, #tpu.memory_space<vmem>>, vector<1x16x8xf32>,
    %33 = vector.shape_cast %31 : vector<1x16x8xf32> to vector<16x8xf32>
    %cst_16 = arith.constant dense<0.000000e+00> : vector<8xf32>
    %34 = vector.multi_reduction <add>, %33, %cst_16 [0] : vector<16x8xf32> to vector<8xf32>
    %35 = vector.shape_cast %34 : vector<8xf32> to vector<1x8xf32>
    %36 = arith.mulf %33, %33 : vector<16x8xf32>
    %cst_17 = arith.constant dense<0.000000e+00> : vector<8xf32>
    %37 = vector.multi_reduction <add>, %36, %cst_17 [0] : vector<16x8xf32> to vector<8xf32>
    %38 = vector.shape_cast %37 : vector<8xf32> to vector<1x8xf32>
    %39 = tpu.concatenate %35, %38 in 1 : vector<1x8xf32>, vector<1x8xf32> -> vector<1x16xf32>
    %c0_18 = arith.constant 0 : index
    %c0_19 = arith.constant 0 : index
    %c0_20 = arith.constant 0 : index
    %40 = vector.load %arg6[%c0_18, %c0_19, %c0_20] : memref<1x1x16xf32, #tpu.memory_space<vmem>>, vector<1x1x16xf32>
    %41 = vector.shape_cast %40 : vector<1x1x16xf32> to vector<1x16xf32>
    %42 = vector.shape_cast %39 : vector<1x16xf32> to vector<1x1x16xf32>
    tpu.vector_store %arg6[%c0_18, %c0_19, %c0_20], %42 {strides = array<i32>} : memref<1x1x16xf32, #tpu.memory_space<vmem>>, vector<1x1x16xf32>,
    return
  }
  func.func @transform_0(%arg0: i32) -> (i32, i32, i32) {
    %c0_i32 = arith.constant 0 : i32
    %c0_i32_0 = arith.constant 0 : i32
    %c0_i32_1 = arith.constant 0 : i32
    return %arg0, %c0_i32, %c0_i32_0 : i32, i32, i32
  }
  func.func @transform_1(%arg0: i32) -> (i32, i32) {
    %c0_i32 = arith.constant 0 : i32
    %c0_i32_0 = arith.constant 0 : i32
    %c0_i32_1 = arith.constant 0 : i32
    return %c0_i32, %c0_i32_0 : i32, i32
  }
  func.func @transform_2(%arg0: i32) -> (i32, i32) {
    %c0_i32 = arith.constant 0 : i32
    %c0_i32_0 = arith.constant 0 : i32
    %c0_i32_1 = arith.constant 0 : i32
    return %c0_i32, %c0_i32_0 : i32, i32
  }
  func.func @transform_3(%arg0: i32) -> (i32, i32, i32) {
    %c0_i32 = arith.constant 0 : i32
    %c0_i32_0 = arith.constant 0 : i32
    %c0_i32_1 = arith.constant 0 : i32
    %c0_i32_2 = arith.constant 0 : i32
    return %c0_i32, %c0_i32_0, %c0_i32_1 : i32, i32, i32
  }
  func.func @transform_4(%arg0: i32) -> (i32, i32, i32) {
    %c0_i32 = arith.constant 0 : i32
    %c0_i32_0 = arith.constant 0 : i32
    %c0_i32_1 = arith.constant 0 : i32
    return %arg0, %c0_i32, %c0_i32_0 : i32, i32, i32
  }
  func.func @transform_5(%arg0: i32) -> (i32, i32, i32) {
    %c0_i32 = arith.constant 0 : i32
    %c0_i32_0 = arith.constant 0 : i32
    %c0_i32_1 = arith.constant 0 : i32
    return %arg0, %c0_i32, %c0_i32_0 : i32, i32, i32
  }
}

</mosaic_0001>

<bundles_post_ra>
// kernel: _up_forward_impl.3
= control target key start
LH: loop header
LB: loop body
LE: loop exit
PB: predicated region body
PF: predicated region fallthrough
CT: control target
= control target key end

     0   :  { %s721_s18 = smov 0   ;;  %s777_s0 = inlined_call_operand.vmem [shape: f32[2,16,8], index: 0, kind: input, shape index: {}]   ;;  %s778_s1 = inlined_call_operand.vmem [shape: f32[1,8], index: 1, kind: input, shape index: {}]   ;;  %s779_s2 = inlined_call_operand.vmem [shape: f32[1,8], index: 2, kind: input, shape index: {}]   ;;  %s780_s3 = inlined_call_operand.vmem [shape: f32[3,8,8], index: 3, kind: input, shape index: {}]   ;;  %s781_s4 = inlined_call_operand.vmem [shape: f32[2,16,8], index: 4, kind: output, shape index: {0}]   ;;  %s782_s5 = inlined_call_operand.vmem [shape: f32[2,1,16], index: 5, kind: output, shape index: {1}]  }
   0x1 LB: > { %s624_s19 = sadd.s32 4294967295, %s688_s18   ;;  %p628_p0 = scmp.ge.s32.totalorder %s688_s18, 1  ;;  %s688_s18 = sphi %s721_s18, %s16_s18  }
   0x2   : > { %p190_p1 = scmp.lt.s32.totalorder %s688_s18, 3 }
   0x4   : > { %p191_p2 = pnand %p628_p0, %p190_p1 }
   0x5   : > { %v256_v0 = vld [vmem:[%s780_s3] sm:$0xff] (!%p191_p2)  ;;  %p221_p3 = scmp.lt.s32.totalorder (!%p191_p2), %s624_s19, 1  ;;  %v258_v1 = vld [vmem:[%s780_s3 + $0x10] sm:$0xff] (!%p191_p2)  ;;  %v257_v2 = vld [vmem:[%s780_s3 + $0x8] sm:$0xff] (!%p191_p2)  ;;  %vm261_vm0 = vcmask (!%p191_p2), 1040384   ;;  %vm273_vm1 = vcmask (!%p191_p2), 64512  }
   0x6   : > { %194 = sbr.rel (%p191_p2) target bundleno = 384 (0x180), region = 36  ;;  %659 = vmatprep.subr.mxu0 (!%p191_p2), %v256_v0  ;;  %654 = vmatprep.subr.mxu1 (!%p191_p2), %v257_v2  ;;  %v633_v3 = vld [vmem:[%s778_s1] ss:$0 sm:$0xff] (!%p191_p2)  ;;  %vm267_vm2 = vcmask (!%p191_p2), 1046528   ;;  %s690_s12 = smov (!%p191_p2), 8   ;;  %vm542_vm3 = vcmask (!%p191_p2), 122880  }
   0x7   : > { %660 = vmatpush3.msra.mxu0 (!%p191_p2), %v256_v0  ;;  %655 = vmatpush3.msra.mxu1 (!%p191_p2), %v257_v2  ;;  %v634_v6 = vld [vmem:[%s779_s2] ss:$0 sm:$0xff] (!%p191_p2) }
   0x8   : > { %664 = vmatprep.subr.mxu0 (!%p191_p2), %v258_v1 }
   0xd   : > { %s784_s19 = smov (!%p221_p3, %s624_s19), 1 }
   0xe   : > { %s643_s26 = sshll.u32 %s784_s19, 4  ;;  %s233_s15 = scalar_lea.vmem %s782_s5, %s784_s19 }
   0xf   : > { %s225_s6 = scalar_lea.vmem %s777_s0, %s643_s26  ;;  %s230_s11 = scalar_lea.vmem %s781_s4, %s643_s26 }
  0x10   : > { %v234_v4 = vld [vmem:[%s225_s6] sm:$0xff]  ;;  %v235_v5 = vld [vmem:[%s225_s6 + $0x8] sm:$0xff] }
  0x11   : > { %v243_v7 = vmul.f32 %v633_v3, %v234_v4  ;;  %v244_v8 = vmul.f32 %v633_v3, %v235_v5 }
  0x13   : > { %v252_v9 = vadd.f32 %v634_v6, %v243_v7  ;;  %v253_v10 = vadd.f32 %v634_v6, %v244_v8 }
  0x15   : > { %v254_v11 = vmax.f32 %v252_v9, 0.0  ;;  %v255_v12 = vmax.f32 %v253_v10, 0.0 }
  0x17   : > { %v262_v13 = vrot.slane %v254_v11, 7  ;;  %v263_v14 = vrot.slane %v255_v12, 7  ;;  %656 = vmatprep.mubr.msk.f32.mxu1 %vm273_vm1, %v254_v11  ;;  %v268_v15 = vrot.slane %v254_v11, 1  ;;  %v269_v16 = vrot.slane %v255_v12, 1 }
  0x18   : > { %657 = vmatmul.mubr.msk.f32.vlgmr.msra.gmra.mrb[0].mxu1 %vm273_vm1, %v255_v12 }
  0x19   : > { %v266_v17 = vsel %vm261_vm0, 0.0, %v262_v13  ;;  %v264_v18 = vsel %vm261_vm0, %v262_v13, %v263_v14  ;;  %v270_v19 = vsel %vm267_vm2, %v268_v15, %v269_v16  ;;  %v272_v20 = vsel %vm267_vm2, %v269_v16, 0.0 }
  0x1a   : > { %661 = vmatprep.mubr.msk.f32.mxu0 %vm273_vm1, %v266_v17 }
  0x1b   : > { %662 = vmatmul.mubr.msk.f32.vlgmr.msra.gmra.mrb[0].mxu0 %vm273_vm1, %v264_v18 }
  0x1c   : > { %665 = vmatpush3.msra.mxu0 %v258_v1  ;;  %666 = vmatprep.mubr.msk.f32.mxu0 %vm273_vm1, %v270_v19 }
  0x23   : > { %667 = vmatmul.mubr.msk.f32.vlgmr.msra.gmra.mrb[0].mxu0 %vm273_vm1, %v272_v20 }
  0xeb   : > { %v658_v21 = vpop.f32.mrb[0].mxu1 }
  0xec   : > { %v344_v22 = vpop.f32.mrb[1].mxu1 }
  0xf6   : > { %v668_v23 = vpop.f32.mrb[0].mxu0 }
  0xf7   : > { %v669_v24 = vadd.f32 %v668_v23, %v658_v21  ;;  %v504_v25 = vpop.f32.mrb[1].mxu0 }
  0xf8   : > { %v670_v26 = vadd.f32 %v504_v25, %v344_v22 }
  0xf9   : > { %516 = vst.msk [vmem:[%s230_s11 + $0x8] sm:$0xff] %vm273_vm1, %v669_v24  ;;  %v518_v27 = vsel %vm273_vm1, %v669_v24, 0.0  ;;  %v527_v28 = vmul.f32 %v669_v24, %v669_v24 }
  0xfa   : > { %515 = vst.msk [vmem:[%s230_s11] sm:$0xff] %vm273_vm1, %v670_v26  ;;  %v517_v29 = vsel %vm273_vm1, %v670_v26, 0.0  ;;  %v526_v30 = vmul.f32 %v670_v26, %v670_v26 }
  0xfb   : > { %v529_v31 = vsel %vm273_vm1, %v527_v28, 0.0  ;;  %v519_v32 = vadd.f32 %v518_v27, %v517_v29 }
  0xfc   : > { %v528_v33 = vsel %vm273_vm1, %v526_v30, 0.0 }
  0xfd   : > { %v530_v34 = vadd.f32 %v529_v31, %v528_v33  ;;  %v520_v41 = vrot.slane %v519_v32, 4 }
  0xff   : > { %v531_v35 = vrot.slane %v530_v34, 4  ;;  %v521_v42 = vadd.f32 %v520_v41, %v519_v32 }
 0x101   : > { %v532_v36 = vadd.f32 %v531_v35, %v530_v34  ;;  %v522_v43 = vrot.slane %v521_v42, 2 }
 0x103   : > { %v533_v37 = vrot.slane %v532_v36, 2  ;;  %v523_v44 = vadd.f32 %v522_v43, %v521_v42 }
 0x105   : > { %v534_v38 = vadd.f32 %v533_v37, %v532_v36  ;;  %v524_v45 = vrot.slane %v523_v44, 1 }
 0x107   : > { %v535_v39 = vrot.slane %v534_v38, 1  ;;  %v525_v46 = vadd.f32 %v524_v45, %v523_v44 }
 0x109   : > { %v536_v40 = vadd.f32 %v535_v39, %v534_v38 }
 0x10b   : > { %538 = vrot.lane.b32.xlu0 %v536_v40, %s690_s12 }
 0x17d   : > { %v539_v47 = vpop.permute.xlu0 %538 }
 0x17e   : > { %v541_v48 = vsel %vm273_vm1, %v525_v46, %v539_v47 }
 0x17f   : > { %543 = vst.msk [vmem:[%s233_s15] sm:$0x1] %vm542_vm3, %v541_v48 }
 0x180 PF: > { %s16_s18 = sadd.s32 1, %s688_s18  }
 0x181   : > { %p13_p4 = scmp.ge.s32.totalorder %s16_s18, 4  }
 0x183   :  { %15 = sbr.rel (!%p13_p4) target bundleno = 1 (0x1), region = 78 }

// kernel: _up_forward_impl.2
= control target key start
LH: loop header
LB: loop body
LE: loop exit
PB: predicated region body
PF: predicated region fallthrough
CT: control target
= control target key end

     0   :  { %s1056_s18 = smov 0   ;;  %s1141_s0 = inlined_call_operand.vmem [shape: f32[2,16,4], index: 0, kind: input, shape index: {}]   ;;  %s1142_s1 = inlined_call_operand.vmem [shape: f32[2,16,4], index: 1, kind: input, shape index: {}]   ;;  %s1143_s2 = inlined_call_operand.vmem [shape: f32[3,4,8], index: 2, kind: input, shape index: {}]   ;;  %s1144_s3 = inlined_call_operand.vmem [shape: f32[3,4,8], index: 3, kind: input, shape index: {}]   ;;  %s1145_s4 = inlined_call_operand.vmem [shape: f32[2,16,8], index: 4, kind: output, shape index: {0}]   ;;  %s1146_s5 = inlined_call_operand.vmem [shape: f32[2,1,16], index: 5, kind: output, shape index: {1}]  }
   0x1 LB: > { %s916_s19 = sadd.s32 4294967295, %s1023_s18   ;;  %p920_p0 = scmp.ge.s32.totalorder %s1023_s18, 1  ;;  %s1023_s18 = sphi %s1056_s18, %s16_s18  }
   0x2   : > { %p200_p1 = scmp.lt.s32.totalorder %s1023_s18, 3 }
   0x4   : > { %p201_p2 = pnand %p920_p0, %p200_p1 }
   0x5   : > { %v257_v0 = vld [vmem:[%s1143_s2 + $0x4] sm:$0xf] (!%p201_p2)  ;;  %vm278_vm0 = vcmask (!%p201_p2), 1043456   ;;  %p236_p3 = scmp.lt.s32.totalorder (!%p201_p2), %s916_s19, 1  ;;  %v256_v2 = vld [vmem:[%s1143_s2] sm:$0xf] (!%p201_p2) }
   0x6   : > { %204 = sbr.rel (%p201_p2) target bundleno = 384 (0x180), region = 36  ;;  %v528_v1 = vld [vmem:[%s1144_s3 + $0x4] sm:$0xf] (!%p201_p2)  ;;  %968 = vmatprep.subr.msk.mxu1 (!%p201_p2), %vm278_vm0, %v257_v0  ;;  %v527_v3 = vld [vmem:[%s1144_s3] sm:$0xf] (!%p201_p2)  ;;  %vm273_vm1 = vcmask (!%p201_p2), 31744  }
   0x7   : > { %983 = vmatprep.subr.msk.mxu0 (!%p201_p2), %vm278_vm0, %v528_v1  ;;  %969 = vmatpush3.msk.msra.mxu1 (!%p201_p2), %vm278_vm0, %v257_v0  ;;  %vm261_vm2 = vcmask (!%p201_p2), 1040384   ;;  %v258_v10 = vld [vmem:[%s1143_s2 + $0x8] sm:$0xf] (!%p201_p2)  ;;  %vm267_vm3 = vcmask (!%p201_p2), 1046528   ;;  %vm794_vm4 = vcmask (!%p201_p2), 64512   ;;  %s1025_s17 = smov (!%p201_p2), 8  }
   0x8   : > { %984 = vmatpush3.msk.msra.mxu0 (!%p201_p2), %vm278_vm0, %v528_v1  ;;  %973 = vmatprep.subr.msk.mxu1 (!%p201_p2), %vm278_vm0, %v256_v2  ;;  %v529_v11 = vld [vmem:[%s1144_s3 + $0x8] sm:$0xf] (!%p201_p2)  ;;  %vm822_vm5 = vcmask (!%p201_p2), 122880  }
   0x9   : > { %988 = vmatprep.subr.msk.mxu0 (!%p201_p2), %vm278_vm0, %v527_v3 }
   0xd   : > { %s1148_s19 = smov (!%p236_p3, %s916_s19), 1 }
   0xe   : > { %s1085_s28 = sshll.u32 %s1148_s19, 4  ;;  %s253_s22 = scalar_lea.vmem %s1146_s5, %s1148_s19 }
   0xf   : > { %s240_s6 = scalar_lea.vmem %s1141_s0, %s1085_s28  ;;  %s245_s9 = scalar_lea.vmem %s1142_s1, %s1085_s28 }
  0x10   : > { %v254_v4 = vld [vmem:[%s240_s6] sm:$0xff]  ;;  %v255_v6 = vld [vmem:[%s240_s6 + $0x8] sm:$0xff]  ;;  %s250_s16 = scalar_lea.vmem %s1145_s4, %s1085_s28 }
  0x11   : > { %v525_v5 = vld [vmem:[%s245_s9] sm:$0xff]  ;;  %v262_v7 = vrot.slane %v254_v4, 7  ;;  %970 = vmatprep.mubr.msk.f32.mxu1 %vm273_vm1, %v254_v4  ;;  %v526_v9 = vld [vmem:[%s245_s9 + $0x8] sm:$0xff]  ;;  %v263_v12 = vrot.slane %v255_v6, 7  ;;  %v268_v16 = vrot.slane %v254_v4, 1  ;;  %v269_v18 = vrot.slane %v255_v6, 1 }
  0x12   : > { %v532_v8 = vrot.slane %v525_v5, 7  ;;  %985 = vmatprep.mubr.msk.f32.mxu0 %vm273_vm1, %v525_v5  ;;  %971 = vmatmul.mubr.msk.f32.vlgmr.msra.gmra.mrb[0].mxu1 %vm273_vm1, %v255_v6  ;;  %v533_v13 = vrot.slane %v526_v9, 7  ;;  %v537_v17 = vrot.slane %v525_v5, 1  ;;  %v538_v19 = vrot.slane %v526_v9, 1 }
  0x13   : > { %986 = vmatmul.mubr.msk.f32.vlgmr.msra.gmra.mrb[0].mxu0 %vm273_vm1, %v526_v9  ;;  %974 = vmatpush3.msk.msra.mxu1 %vm278_vm0, %v256_v2  ;;  %v266_v14 = vsel %vm261_vm2, 0.0, %v262_v7  ;;  %v264_v20 = vsel %vm261_vm2, %v262_v7, %v263_v12  ;;  %v270_v22 = vsel %vm267_vm3, %v268_v16, %v269_v18  ;;  %v272_v24 = vsel %vm267_vm3, %v269_v18, 0.0 }
  0x14   : > { %989 = vmatpush3.msk.msra.mxu0 %vm278_vm0, %v527_v3  ;;  %v536_v15 = vsel %vm261_vm2, 0.0, %v532_v8  ;;  %975 = vmatprep.mubr.msk.f32.mxu1 %vm273_vm1, %v266_v14  ;;  %v534_v21 = vsel %vm261_vm2, %v532_v8, %v533_v13  ;;  %v539_v23 = vsel %vm267_vm3, %v537_v17, %v538_v19  ;;  %v541_v25 = vsel %vm267_vm3, %v538_v19, 0.0 }
  0x15   : > { %978 = vmatprep.subr.msk.mxu1 %vm278_vm0, %v258_v10  ;;  %990 = vmatprep.mubr.msk.f32.mxu0 %vm273_vm1, %v536_v15 }
  0x16   : > { %993 = vmatprep.subr.msk.mxu0 %vm278_vm0, %v529_v11 }
  0x1a   : > { %976 = vmatmul.mubr.msk.f32.vlgmr.msra.gmra.mrb[0].mxu1 %vm273_vm1, %v264_v20 }
  0x1b   : > { %991 = vmatmul.mubr.msk.f32.vlgmr.msra.gmra.mrb[0].mxu0 %vm273_vm1, %v534_v21  ;;  %979 = vmatpush3.msk.msra.mxu1 %vm278_vm0, %v258_v10 }
  0x1c   : > { %994 = vmatpush3.msk.msra.mxu0 %vm278_vm0, %v529_v11  ;;  %980 = vmatprep.mubr.msk.f32.mxu1 %vm273_vm1, %v270_v22 }
  0x1d   : > { %995 = vmatprep.mubr.msk.f32.mxu0 %vm273_vm1, %v539_v23 }
  0x22   : > { %981 = vmatmul.mubr.msk.f32.vlgmr.msra.gmra.mrb[0].mxu1 %vm273_vm1, %v272_v24 }
  0x23   : > { %996 = vmatmul.mubr.msk.f32.vlgmr.msra.gmra.mrb[0].mxu0 %vm273_vm1, %v541_v25 }
  0xf5   : > { %v982_v26 = vpop.f32.mrb[0].mxu1 }
  0xf6   : > { %v997_v27 = vpop.f32.mrb[0].mxu0  ;;  %v514_v29 = vpop.f32.mrb[1].mxu1 }
  0xf7   : > { %v998_v28 = vadd.f32 %v997_v27, %v982_v26  ;;  %v781_v30 = vpop.f32.mrb[1].mxu0 }
  0xf8   : > { %v999_v31 = vadd.f32 %v781_v30, %v514_v29 }
  0xf9   : > { %796 = vst.msk [vmem:[%s250_s16 + $0x8] sm:$0xff] %vm794_vm4, %v998_v28  ;;  %v798_v32 = vsel %vm794_vm4, %v998_v28, 0.0  ;;  %v807_v33 = vmul.f32 %v998_v28, %v998_v28 }
  0xfa   : > { %795 = vst.msk [vmem:[%s250_s16] sm:$0xff] %vm794_vm4, %v999_v31  ;;  %v797_v34 = vsel %vm794_vm4, %v999_v31, 0.0  ;;  %v806_v35 = vmul.f32 %v999_v31, %v999_v31 }
  0xfb   : > { %v809_v36 = vsel %vm794_vm4, %v807_v33, 0.0  ;;  %v799_v37 = vadd.f32 %v798_v32, %v797_v34 }
  0xfc   : > { %v808_v38 = vsel %vm794_vm4, %v806_v35, 0.0 }
  0xfd   : > { %v810_v39 = vadd.f32 %v809_v36, %v808_v38  ;;  %v800_v46 = vrot.slane %v799_v37, 4 }
  0xff   : > { %v811_v40 = vrot.slane %v810_v39, 4  ;;  %v801_v47 = vadd.f32 %v800_v46, %v799_v37 }
 0x101   : > { %v812_v41 = vadd.f32 %v811_v40, %v810_v39  ;;  %v802_v48 = vrot.slane %v801_v47, 2 }
 0x103   : > { %v813_v42 = vrot.slane %v812_v41, 2  ;;  %v803_v49 = vadd.f32 %v802_v48, %v801_v47 }
 0x105   : > { %v814_v43 = vadd.f32 %v813_v42, %v812_v41  ;;  %v804_v50 = vrot.slane %v803_v49, 1 }
 0x107   : > { %v815_v44 = vrot.slane %v814_v43, 1  ;;  %v805_v51 = vadd.f32 %v804_v50, %v803_v49 }
 0x109   : > { %v816_v45 = vadd.f32 %v815_v44, %v814_v43 }
 0x10b   : > { %818 = vrot.lane.b32.xlu0 %v816_v45, %s1025_s17 }
 0x17d   : > { %v819_v52 = vpop.permute.xlu0 %818 }
 0x17e   : > { %v821_v53 = vsel %vm794_vm4, %v805_v51, %v819_v52 }
 0x17f   : > { %823 = vst.msk [vmem:[%s253_s22] sm:$0x1] %vm822_vm5, %v821_v53 }
 0x180 PF: > { %s16_s18 = sadd.s32 1, %s1023_s18  }
 0x181   : > { %p13_p4 = scmp.ge.s32.totalorder %s16_s18, 4  }
 0x183   :  { %15 = sbr.rel (!%p13_p4) target bundleno = 1 (0x1), region = 81 }

</bundles_post_ra>
